<compile_context>
chip_gen: v7x
topology: tpu7x:2x2x1
jax: 0.10.0
libtpu: 0.0.40
codegen_flags: <defaults>
</compile_context>

<pallas_src>
import functools
import math

import jax
import jax.numpy as jnp
import numpy as np
from jax.experimental import pallas as pl
from jax.experimental.pallas import tpu as pltpu

LOG_STD_MAX = 2.0
LOG_STD_MIN = -5.0

_MIN_TILE = 16  # bf16 packs 16 rows per sublane group


def _round_up(x, m):
    return ((x + m - 1) // m) * m


def _device_kind():
    try:
        return jax.devices()[0].device_kind.lower()
    except Exception:
        return ""


def _num_tensorcores(kind):
    # v7x exposes 2 TensorCores per device to the 'parallel' grid axis;
    # v4/v5p megacore likewise.  v5e / v6e are single-TC.
    return 2 if any(tag in kind for tag in ("v7", "v4", "v5p", "v5 p")) else 1


def _is_v5e(kind):
    return ("v5 lite" in kind) or ("v5lite" in kind) or ("v5e" in kind)


def _choose_batch_tiling(B, n_tc):
    """Return (B_pad, batch_tile).

    Tiles are always >=16 rows (bf16 sublane packing) and MXU-height aligned.
    Single-TC chips (v5e/v6e): one big step for small batches, 512/256/128
    divisors for large ones.  Dual-TC chips (v7x): an even number of >=2
    steps so the 'parallel' batch axis shards evenly across both cores.
    If no clean divisor exists, the batch is padded rather than shrinking the
    tile below the MXU height.
    """
    if n_tc <= 1:
        if B <= 512:
            tile = max(_round_up(B, _MIN_TILE), _MIN_TILE)
            return tile, tile
        for tile in (512, 256, 128):
            if B % tile == 0:
                return B, tile
        return _round_up(B, 256), 256
    # two TensorCores: even number of steps, each tile as large as reasonable
    half = pl.cdiv(B, 2)
    if half <= 256:
        tile = max(_round_up(half, _MIN_TILE), _MIN_TILE)
        return 2 * tile, tile
    for tile in (256, 512, 128):
        if B % (2 * tile) == 0:
            return B, tile
    return _round_up(B, 512), 256


def _actor_kernel(n_hidden, act_dim, relu_bf16, x_ref, *refs):
    # refs layout:
    #   [w_0, b_0, ..., w_{n_hidden-1}, b_{n_hidden-1},   hidden relu layers
    #    w_head, b_head,                                  fused (mean|log_std) head
    #    out_ref]                                         lane-dense output
    param_refs = refs[: 2 * n_hidden + 2]
    out_ref = refs[2 * n_hidden + 2]

    # x arrives as bf16 (cast in the wrapper); matmuls accumulate in f32.
    h = x_ref[...]
    for i in range(n_hidden):
        w = param_refs[2 * i][...]            # bf16 [in, 256]
        b = param_refs[2 * i + 1][...]        # f32  [1, 256]
        a = jnp.dot(h, w, preferred_element_type=jnp.float32) + b
        if relu_bf16:
            # bf16-capable VALU (v6e/v7x): ReLU on packed bf16 vregs.
            h = jnp.maximum(a.astype(jnp.bfloat16), 0)
        else:
            # v5e: no bf16 VALU, keep the max in f32 then pack.
            h = jnp.maximum(a, 0.0).astype(jnp.bfloat16)

    # Fused, lane-padded head: columns [0, act_dim) -> mean,
    # [act_dim, 2*act_dim) -> log_std, the rest is zero padding.
    w_hd = param_refs[2 * n_hidden][...]      # bf16 [in, head_pad]
    b_hd = param_refs[2 * n_hidden + 1][...]  # f32  [1, head_pad]
    y = jnp.dot(h, w_hd, preferred_element_type=jnp.float32) + b_hd

    # tanh squash + affine only on the log_std columns.  With head_pad == 128
    # the whole head is a single vreg lane-column, so one EUP tanh per
    # sublane group is already the minimum for a lane-dense store.
    # (If act_dim ever grows past 64, lay out [mean|pad128|log_std|pad128]
    #  and tanh only the 128-aligned log_std slab.)
    squashed = LOG_STD_MIN + 0.5 * (LOG_STD_MAX - LOG_STD_MIN) * (jnp.tanh(y) + 1.0)
    cols = jax.lax.broadcasted_iota(jnp.int32, y.shape, 1)
    is_logstd = (cols >= act_dim) & (cols < 2 * act_dim)
    out_ref[...] = jnp.where(is_logstd, squashed, y).astype(out_ref.dtype)


def actor_forward(x, params, *, batch_tile=None):
    """params: list of (W[in,out] f32, b[out] f32) pairs; the last two pairs
    are the mean / log_std heads, the earlier ones are relu hidden layers.
    Returns (mean [B, act_dim], log_std [B, act_dim]) in f32."""
    B, obs_dim = x.shape
    act_dim = params[-1][0].shape[1]
    n_hidden = len(params) - 2
    head_in = params[-2][0].shape[0]
    head_pad = _round_up(max(2 * act_dim, 128), 128)  # lane-dense output width

    kind = _device_kind()
    n_tc = _num_tensorcores(kind)
    relu_bf16 = not _is_v5e(kind)

    if batch_tile is None:
        B_pad, batch_tile = _choose_batch_tiling(B, n_tc)
    else:
        batch_tile = max(_round_up(batch_tile, _MIN_TILE), _MIN_TILE)
        B_pad = _round_up(B, batch_tile)
    grid = (B_pad // batch_tile,)

    # bf16 input -> half the per-step x DMA, no in-kernel cast.  Pad the
    # batch (with zeros) instead of shrinking the tile for awkward B.
    x_bf = x.astype(jnp.bfloat16)
    if B_pad != B:
        x_bf = jnp.pad(x_bf, ((0, B_pad - B), (0, 0)))

    # ---- prepare kernel-side parameters -------------------------------
    in_specs = [pl.BlockSpec((batch_tile, obs_dim), lambda i: (i, 0))]
    kernel_params = []
    for (w, b) in params[:n_hidden]:
        wq = w.astype(jnp.bfloat16)
        b2 = b.reshape(1, -1).astype(jnp.float32)
        in_specs.append(pl.BlockSpec(wq.shape, lambda i: (0, 0)))
        in_specs.append(pl.BlockSpec(b2.shape, lambda i: (0, 0)))
        kernel_params.extend([wq, b2])

    # fuse the two heads into one zero-padded [head_in, head_pad] matrix
    # TODO(synk): if downstream SAC needs tighter log_std precision, keep the
    # head weights in f32 (tiny matmul, negligible cost).
    w_m, b_m = params[-2]
    w_s, b_s = params[-1]
    w_head = jnp.zeros((head_in, head_pad), jnp.float32)
    w_head = w_head.at[:, :act_dim].set(w_m)
    w_head = w_head.at[:, act_dim:2 * act_dim].set(w_s)
    w_head = w_head.astype(jnp.bfloat16)
    b_head = jnp.zeros((1, head_pad), jnp.float32)
    b_head = b_head.at[0, :act_dim].set(b_m)
    b_head = b_head.at[0, act_dim:2 * act_dim].set(b_s)
    in_specs.append(pl.BlockSpec(w_head.shape, lambda i: (0, 0)))
    in_specs.append(pl.BlockSpec(b_head.shape, lambda i: (0, 0)))
    kernel_params.extend([w_head, b_head])

    out_specs = pl.BlockSpec((batch_tile, head_pad), lambda i: (i, 0))
    out_shape = jax.ShapeDtypeStruct((B_pad, head_pad), jnp.float32)

    # ---- advisory cost estimate ----------------------------------------
    flops = 0
    for (w, _) in params[:n_hidden]:
        flops += 2 * B_pad * int(w.shape[0]) * int(w.shape[1])
    flops += 2 * B_pad * head_in * head_pad
    bytes_accessed = int(x_bf.size) * x_bf.dtype.itemsize + B_pad * head_pad * 4
    for arr in kernel_params:
        bytes_accessed += int(arr.size) * arr.dtype.itemsize

    kernel = functools.partial(_actor_kernel, n_hidden, act_dim, relu_bf16)
    out = pl.pallas_call(
        kernel,
        grid=grid,
        in_specs=in_specs,
        out_specs=out_specs,
        out_shape=out_shape,
        compiler_params=pltpu.CompilerParams(
            dimension_semantics=("parallel",),
        ),
        cost_estimate=pl.CostEstimate(
            flops=flops,
            transcendentals=B_pad * head_pad,
            bytes_accessed=bytes_accessed,
        ),
    )(x_bf, *kernel_params)

    mean = out[:B, :act_dim]
    log_std = out[:B, act_dim:2 * act_dim]
    return mean, log_std


def init_actor_params(key, obs_dim, act_dim, n_layers):
    """Mirrors Actor.__init__ layer-shape logic (PyTorch default-style uniform
    init, deterministic via PRNGKey). Weights stored as [in, out]."""
    if n_layers > 0:
        in_dims = [obs_dim] + [256] * (n_layers + 1)
    else:
        in_dims = [obs_dim, obs_dim]
    out_dims = [256] * n_layers + [act_dim, act_dim]

    params = []
    for in_dim, out_dim in zip(in_dims, out_dims):
        key, kw, kb = jax.random.split(key, 3)
        bound = 1.0 / math.sqrt(in_dim)
        w = jax.random.uniform(kw, (in_dim, out_dim), jnp.float32, -bound, bound)
        b = jax.random.uniform(kb, (out_dim,), jnp.float32, -bound, bound)
        params.append((w, b))
    return params


def actor_forward_ref(x, params):
    """Exact f32 reference (PyTorch semantics)."""
    n_hidden = len(params) - 2
    h = x
    for i in range(n_hidden):
        w, b = params[i]
        h = jnp.maximum(h @ w + b, 0.0)
    w_m, b_m = params[-2]
    w_s, b_s = params[-1]
    mean = h @ w_m + b_m
    log_std = jnp.tanh(h @ w_s + b_s)
    log_std = LOG_STD_MIN + 0.5 * (LOG_STD_MAX - LOG_STD_MIN) * (log_std + 1.0)
    return mean, log_std


def actor_forward_ref_bf16(x, params):
    """Reference with the same bf16-input / f32-accumulate precision the
    kernel uses (for tight numerical comparison)."""
    n_hidden = len(params) - 2
    h = x.astype(jnp.bfloat16)
    for i in range(n_hidden):
        w, b = params[i]
        a = jnp.dot(h, w.astype(jnp.bfloat16),
                    preferred_element_type=jnp.float32) + b
        h = jnp.maximum(a, 0.0).astype(jnp.bfloat16)
    w_m, b_m = params[-2]
    w_s, b_s = params[-1]
    mean = jnp.dot(h, w_m.astype(jnp.bfloat16),
                   preferred_element_type=jnp.float32) + b_m
    log_std = jnp.dot(h, w_s.astype(jnp.bfloat16),
                      preferred_element_type=jnp.float32) + b_s
    log_std = jnp.tanh(log_std)
    log_std = LOG_STD_MIN + 0.5 * (LOG_STD_MAX - LOG_STD_MIN) * (log_std + 1.0)
    return mean, log_std


def _check(x, params):
    mean, log_std = actor_forward(x, params)
    jax.block_until_ready((mean, log_std))

    # Tight check against a reference using the same bf16/f32 precision.
    mean_bf, log_std_bf = actor_forward_ref_bf16(x, params)
    np.testing.assert_allclose(np.asarray(mean), np.asarray(mean_bf),
                               rtol=1e-2, atol=1e-2)
    np.testing.assert_allclose(np.asarray(log_std), np.asarray(log_std_bf),
                               rtol=1e-2, atol=1e-2)

    # Loose semantic check against the exact f32 PyTorch math.
    mean_f32, log_std_f32 = actor_forward_ref(x, params)
    np.testing.assert_allclose(np.asarray(mean), np.asarray(mean_f32),
                               rtol=1e-1, atol=1e-1)
    np.testing.assert_allclose(np.asarray(log_std), np.asarray(log_std_f32),
                               rtol=1e-1, atol=1e-1)


if __name__ == "__main__":
    key = jax.random.PRNGKey(0)
    obs_dim, act_dim, n_layers = 16, 4, 2

    key, kx, kp = jax.random.split(key, 3)
    params = init_actor_params(kp, obs_dim, act_dim, n_layers)

    # Small batch: single (or one-per-core) grid step.
    x_small = jax.random.normal(kx, (16, obs_dim), jnp.float32)
    _check(x_small, params)

    # Awkward batch (1000): exercises the pad-and-slice path instead of the
    # old 8-row-tile fallback.
    key, kx2 = jax.random.split(key)
    x_big = jax.random.normal(kx2, (1000, obs_dim), jnp.float32)
    _check(x_big, params)

    # TODO(synk): get_action's sampling (randn_like), tanh squash of the
    # action, and the log_prob correction remain in plain JAX consuming
    # (mean, log_std); only forward() is kernelized.
    print("KERNEL_OK")
</pallas_src>

<mosaic_0001>
module attributes {stable_mosaic.version = 11 : i64} {
  func.func @_actor_kernel(%arg0: i32, %arg1: memref<16x16xbf16, #tpu.memory_space<vmem>>, %arg2: memref<16x256xbf16, #tpu.memory_space<vmem>>, %arg3: memref<1x256xf32, #tpu.memory_space<vmem>>, %arg4: memref<256x256xbf16, #tpu.memory_space<vmem>>, %arg5: memref<1x256xf32, #tpu.memory_space<vmem>>, %arg6: memref<256x128xbf16, #tpu.memory_space<vmem>>, %arg7: memref<1x128xf32, #tpu.memory_space<vmem>>, %arg8: memref<16x128xf32, #tpu.memory_space<vmem>>) attributes {dimension_semantics = [#tpu.dimension_semantics<parallel>], iteration_bounds = array<i64: 1>, scalar_prefetch = 0 : i64, scratch_operands = 0 : i64, tpu.core_type = #tpu.core_type<tc>, window_params = [{transform_indices = @transform_0, window_bounds = array<i64: 16, 16>}, {pipeline_mode = #tpu.pipeline_mode<synchronous>, transform_indices = @transform_1, window_bounds = array<i64: 16, 256>}, {pipeline_mode = #tpu.pipeline_mode<synchronous>, transform_indices = @transform_2, window_bounds = array<i64: 1, 256>}, {pipeline_mode = #tpu.pipeline_mode<synchronous>, transform_indices = @transform_3, window_bounds = array<i64: 256, 256>}, {pipeline_mode = #tpu.pipeline_mode<synchronous>, transform_indices = @transform_4, window_bounds = array<i64: 1, 256>}, {pipeline_mode = #tpu.pipeline_mode<synchronous>, transform_indices = @transform_5, window_bounds = array<i64: 256, 128>}, {pipeline_mode = #tpu.pipeline_mode<synchronous>, transform_indices = @transform_6, window_bounds = array<i64: 1, 128>}, {transform_indices = @transform_7, window_bounds = array<i64: 16, 128>}]} {
    %c0 = arith.constant 0 : index
    %c0_0 = arith.constant 0 : index
    %0 = vector.load %arg1[%c0, %c0_0] : memref<16x16xbf16, #tpu.memory_space<vmem>>, vector<16x16xbf16>
    %c0_1 = arith.constant 0 : index
    %c0_2 = arith.constant 0 : index
    %1 = vector.load %arg2[%c0_1, %c0_2] : memref<16x256xbf16, #tpu.memory_space<vmem>>, vector<16x256xbf16>
    %c0_3 = arith.constant 0 : index
    %c0_4 = arith.constant 0 : index
    %2 = vector.load %arg3[%c0_3, %c0_4] : memref<1x256xf32, #tpu.memory_space<vmem>>, vector<1x256xf32>
    %cst = arith.constant dense<0.000000e+00> : vector<16x256xf32>
    %3 = tpu.matmul %0, %1, %cst {dimension_numbers = #tpu.dot_dimension_numbers<[1], [0], [0], [1], [0, 0, 1, 1], [], []>} : vector<16x16xbf16>, vector<16x256xbf16>, vector<16x256xf32> -> vector<16x256xf32>
    %4 = vector.broadcast %2 : vector<1x256xf32> to vector<16x256xf32>
    %5 = arith.addf %3, %4 : vector<16x256xf32>
    %6 = arith.truncf %5 : vector<16x256xf32> to vector<16x256xbf16>
    %cst_5 = arith.constant 0.000000e+00 : bf16
    %7 = vector.broadcast %cst_5 : bf16 to vector<16x256xbf16>
    %8 = arith.maximumf %6, %7 : vector<16x256xbf16>
    %c0_6 = arith.constant 0 : index
    %c0_7 = arith.constant 0 : index
    %9 = vector.load %arg4[%c0_6, %c0_7] : memref<256x256xbf16, #tpu.memory_space<vmem>>, vector<256x256xbf16>
    %c0_8 = arith.constant 0 : index
    %c0_9 = arith.constant 0 : index
    %10 = vector.load %arg5[%c0_8, %c0_9] : memref<1x256xf32, #tpu.memory_space<vmem>>, vector<1x256xf32>
    %cst_10 = arith.constant dense<0.000000e+00> : vector<16x256xf32>
    %11 = tpu.matmul %8, %9, %cst_10 {dimension_numbers = #tpu.dot_dimension_numbers<[1], [0], [0], [1], [0, 0, 1, 1], [], []>} : vector<16x256xbf16>, vector<256x256xbf16>, vector<16x256xf32> -> vector<16x256xf32>
    %12 = vector.broadcast %10 : vector<1x256xf32> to vector<16x256xf32>
    %13 = arith.addf %11, %12 : vector<16x256xf32>
    %14 = arith.truncf %13 : vector<16x256xf32> to vector<16x256xbf16>
    %cst_11 = arith.constant 0.000000e+00 : bf16
    %15 = vector.broadcast %cst_11 : bf16 to vector<16x256xbf16>
    %16 = arith.maximumf %14, %15 : vector<16x256xbf16>
    %c0_12 = arith.constant 0 : index
    %c0_13 = arith.constant 0 : index
    %17 = vector.load %arg6[%c0_12, %c0_13] : memref<256x128xbf16, #tpu.memory_space<vmem>>, vector<256x128xbf16>
    %c0_14 = arith.constant 0 : index
    %c0_15 = arith.constant 0 : index
    %18 = vector.load %arg7[%c0_14, %c0_15] : memref<1x128xf32, #tpu.memory_space<vmem>>, vector<1x128xf32>
    %cst_16 = arith.constant dense<0.000000e+00> : vector<16x128xf32>
    %19 = tpu.matmul %16, %17, %cst_16 {dimension_numbers = #tpu.dot_dimension_numbers<[1], [0], [0], [1], [0, 0, 1, 1], [], []>} : vector<16x256xbf16>, vector<256x128xbf16>, vector<16x128xf32> -> vector<16x128xf32>
    %20 = vector.broadcast %18 : vector<1x128xf32> to vector<16x128xf32>
    %21 = arith.addf %19, %20 : vector<16x128xf32>
    %22 = math.tanh %21 : vector<16x128xf32>
    %cst_17 = arith.constant 1.000000e+00 : f32
    %23 = vector.broadcast %cst_17 : f32 to vector<16x128xf32>
    %24 = arith.addf %22, %23 : vector<16x128xf32>
    %cst_18 = arith.constant 3.500000e+00 : f32
    %25 = vector.broadcast %cst_18 : f32 to vector<16x128xf32>
    %26 = arith.mulf %25, %24 : vector<16x128xf32>
    %cst_19 = arith.constant -5.000000e+00 : f32
    %27 = vector.broadcast %cst_19 : f32 to vector<16x128xf32>
    %28 = arith.addf %27, %26 : vector<16x128xf32>
    %29 = tpu.iota {dimensions = array<i32: 1>} : vector<16x128xi32>
    %c4_i32 = arith.constant 4 : i32
    %30 = vector.broadcast %c4_i32 : i32 to vector<16x128xi32>
    %31 = arith.cmpi sge, %29, %30 : vector<16x128xi32>
    %c8_i32 = arith.constant 8 : i32
    %32 = vector.broadcast %c8_i32 : i32 to vector<16x128xi32>
    %33 = arith.cmpi slt, %29, %32 : vector<16x128xi32>
    %34 = arith.andi %31, %33 : vector<16x128xi1>
    %35 = arith.select %34, %28, %21 : vector<16x128xi1>, vector<16x128xf32>
    %c0_20 = arith.constant 0 : index
    %c0_21 = arith.constant 0 : index
    %36 = vector.load %arg8[%c0_20, %c0_21] : memref<16x128xf32, #tpu.memory_space<vmem>>, vector<16x128xf32>
    tpu.vector_store %arg8[%c0_20, %c0_21], %35 {strides = array<i32>} : memref<16x128xf32, #tpu.memory_space<vmem>>, vector<16x128xf32>,
    return
  }
  func.func @transform_0(%arg0: i32) -> (i32, i32) {
    %c0_i32 = arith.constant 0 : i32
    %c0_i32_0 = arith.constant 0 : i32
    return %arg0, %c0_i32 : i32, i32
  }
  func.func @transform_1(%arg0: i32) -> (i32, i32) {
    %c0_i32 = arith.constant 0 : i32
    %c0_i32_0 = arith.constant 0 : i32
    %c0_i32_1 = arith.constant 0 : i32
    return %c0_i32, %c0_i32_0 : i32, i32
  }
  func.func @transform_2(%arg0: i32) -> (i32, i32) {
    %c0_i32 = arith.constant 0 : i32
    %c0_i32_0 = arith.constant 0 : i32
    %c0_i32_1 = arith.constant 0 : i32
    return %c0_i32, %c0_i32_0 : i32, i32
  }
  func.func @transform_3(%arg0: i32) -> (i32, i32) {
    %c0_i32 = arith.constant 0 : i32
    %c0_i32_0 = arith.constant 0 : i32
    %c0_i32_1 = arith.constant 0 : i32
    return %c0_i32, %c0_i32_0 : i32, i32
  }
  func.func @transform_4(%arg0: i32) -> (i32, i32) {
    %c0_i32 = arith.constant 0 : i32
    %c0_i32_0 = arith.constant 0 : i32
    %c0_i32_1 = arith.constant 0 : i32
    return %c0_i32, %c0_i32_0 : i32, i32
  }
  func.func @transform_5(%arg0: i32) -> (i32, i32) {
    %c0_i32 = arith.constant 0 : i32
    %c0_i32_0 = arith.constant 0 : i32
    %c0_i32_1 = arith.constant 0 : i32
    return %c0_i32, %c0_i32_0 : i32, i32
  }
  func.func @transform_6(%arg0: i32) -> (i32, i32) {
    %c0_i32 = arith.constant 0 : i32
    %c0_i32_0 = arith.constant 0 : i32
    %c0_i32_1 = arith.constant 0 : i32
    return %c0_i32, %c0_i32_0 : i32, i32
  }
  func.func @transform_7(%arg0: i32) -> (i32, i32) {
    %c0_i32 = arith.constant 0 : i32
    %c0_i32_0 = arith.constant 0 : i32
    return %arg0, %c0_i32 : i32, i32
  }
}

</mosaic_0001>

<bundles_post_ra>
// kernel: tpu_custom_call.1
= control target key start
LH: loop header
LB: loop body
LE: loop exit
PB: predicated region body
PF: predicated region fallthrough
CT: control target
= control target key end

     0   :  { %12 = vsyncpa [#allocation3], 0  ;;  %s1049_s0 = inlined_call_operand.hbm [shape: bf16[16,16], index: 0, kind: input, shape index: {}]   ;;  %s1050_s1 = inlined_call_operand.hbm [shape: bf16[16,256], index: 1, kind: input, shape index: {}]   ;;  %s1051_s2 = inlined_call_operand.vmem [shape: f32[1,256], index: 2, kind: input, shape index: {}]   ;;  %s1052_s3 = inlined_call_operand.hbm [shape: bf16[256,256], index: 3, kind: input, shape index: {}]   ;;  %s1053_s4 = inlined_call_operand.vmem [shape: f32[1,256], index: 4, kind: input, shape index: {}]   ;;  %s1054_s5 = inlined_call_operand.hbm [shape: bf16[256,128], index: 5, kind: input, shape index: {}]   ;;  %s1055_s6 = inlined_call_operand.vmem [shape: f32[1,128], index: 6, kind: input, shape index: {}]   ;;  %s1056_s7 = inlined_call_operand.hbm [shape: f32[16,128], index: 7, kind: output, shape index: {}]  }
   0x1   :  { %13 = vsyncpa [#allocation6], 0 }
   0x2   :  { %14 = vsyncpa [#allocation9], 0 }
   0x3   :  { %15 = vsyncpa [#allocation4], 0  ;;  %s903_s24 = smov [#allocation5]   ;;  %s785_s28 = scalar_lea.hbm %s1050_s1, 256 }
   0x4   :  { %s33_s25 = sshll.u32 %s903_s24, 4  ;;  %p786_p0 = scmp.ne.s32.totalorder %s1050_s1, %s785_s28  ;;  %s34_s25 = int_to_ptr.vmem [resolvable:$true] %s33_s25 }
   0x5   :  { %p789_p1 = scmp.lt.u32.totalorder %s785_s28, %s1050_s1 }
   0x7   :  { %p791_p2 = pnand %p789_p1, %p786_p0 }
   0x9   :  { %794 = shalt.err (!%p791_p2)
}
   0xa   :  { %s795_s10 = scalar_lea.vmem %s34_s25, 256  ;;  %p800_p4 = scmp.lt.s32.totalorder %s34_s25, %s34_s25 }
   0xb   :  { %p796_p3 = scmp.ne.s32.totalorder %s34_s25, %s795_s10  ;;  %p801_p5 = scmp.lt.s32.totalorder %s795_s10, %s795_s10 }
   0xd   :  { %p802_p6 = por %p801_p5, %p800_p4 }
   0xf   :  { %p803_p7 = pnand %p802_p6, %p796_p3 }
  0x11   :  { %806 = shalt.err (!%p803_p7)
}
  0x12   :  { %s904_s11 = smov 128   ;;  %s905_s12 = smov 8  }
  0x13   :  { %39 = dma.hbm_to_vmem [thread:$0]  %s1050_s1, 256, %s34_s25, [#allocation6], %s904_s11, %s904_s11, %s905_s12  }
  0x14   :  { %s906_s15 = smov [#allocation2]   ;;  %s807_s19 = scalar_lea.hbm %s1049_s0, 128 }
  0x15   :  { %s21_s16 = sshll.u32 %s906_s15, 4  ;;  %p808_p8 = scmp.ne.s32.totalorder %s1049_s0, %s807_s19  ;;  %s22_s16 = int_to_ptr.vmem [resolvable:$true] %s21_s16 }
  0x16   :  { %p811_p9 = scmp.lt.u32.totalorder %s807_s19, %s1049_s0 }
  0x18   :  { %p813_p10 = pnand %p811_p9, %p808_p8 }
  0x1a   :  { %816 = shalt.err (!%p813_p10)
}
  0x1b   :  { %s817_s24 = scalar_lea.vmem %s22_s16, 128  ;;  %p822_p12 = scmp.lt.s32.totalorder %s22_s16, %s22_s16 }
  0x1c   :  { %p818_p11 = scmp.ne.s32.totalorder %s22_s16, %s817_s24  ;;  %p823_p13 = scmp.lt.s32.totalorder %s817_s24, %s817_s24 }
  0x1e   :  { %p824_p0 = por %p823_p13, %p822_p12 }
  0x20   :  { %p825_p1 = pnand %p824_p0, %p818_p11 }
  0x22   :  { %828 = shalt.err (!%p825_p1)
}
  0x23   :  { %s907_s1 = smov 64   ;;  %s908_s25 = smov 4  }
  0x24   :  { %27 = dma.hbm_to_vmem [thread:$0]  %s1049_s0, 128, %s22_s16, [#allocation3], %s907_s1, %s907_s1, %s908_s25  }
  0x25   :  { %s909_s28 = smov [#allocation7]   ;;  %s910_s30 = smov [#allocation8]  }
  0x26   :  { %s47_s29 = sshll.u32 %s909_s28, 4  ;;  %s61_s8 = sshll.u32 %s910_s30, 4  ;;  %s48_s29 = int_to_ptr.vmem [resolvable:$true] %s47_s29  ;;  %s983_s8 = int_to_ptr.vmem [resolvable:$true] %s61_s8 }
  0x27   :  { %s829_s13 = scalar_lea.hbm %s1052_s3, 4096 }
  0x28   :  { %p830_p2 = scmp.ne.s32.totalorder %s1052_s3, %s829_s13  ;;  %p833_p3 = scmp.lt.u32.totalorder %s829_s13, %s1052_s3 }
  0x2a   :  { %p835_p4 = pnand %p833_p3, %p830_p2 }
  0x2c   :  { %838 = shalt.err (!%p835_p4)
}
  0x2d   :  { %s839_s0 = scalar_lea.vmem %s48_s29, 4096  ;;  %p844_p6 = scmp.lt.s32.totalorder %s48_s29, %s48_s29 }
  0x2e   :  { %p840_p5 = scmp.ne.s32.totalorder %s48_s29, %s839_s0  ;;  %p845_p7 = scmp.lt.s32.totalorder %s839_s0, %s839_s0 }
  0x30   :  { %p846_p8 = por %p845_p7, %p844_p6 }
  0x32   :  { %p847_p9 = pnand %p846_p8, %p840_p5 }
  0x34   :  { %850 = shalt.err (!%p847_p9)
}
  0x35   :  { %53 = dma.hbm_to_vmem [thread:$0]  %s1052_s3, 4096, %s48_s29, [#allocation6], %s904_s11, %s904_s11, %s905_s12  }
  0x36   :  { %s851_s22 = scalar_lea.hbm %s1054_s5, 2048 }
  0x37   :  { %p852_p10 = scmp.ne.s32.totalorder %s1054_s5, %s851_s22  ;;  %p855_p11 = scmp.lt.u32.totalorder %s851_s22, %s1054_s5 }
  0x39   :  { %p857_p12 = pnand %p855_p11, %p852_p10 }
  0x3b   :  { %860 = shalt.err (!%p857_p12)
}
  0x3c   :  { %s861_s28 = scalar_lea.vmem %s983_s8, 2048  ;;  %p866_p0 = scmp.lt.s32.totalorder %s983_s8, %s983_s8 }
  0x3d   :  { %p862_p13 = scmp.ne.s32.totalorder %s983_s8, %s861_s28  ;;  %p867_p1 = scmp.lt.s32.totalorder %s861_s28, %s861_s28 }
  0x3f   :  { %p868_p2 = por %p867_p1, %p866_p0 }
  0x41   :  { %p869_p3 = pnand %p868_p2, %p862_p13 }
  0x43   :  { %872 = shalt.err (!%p869_p3)
}
  0x44   :  { %67 = dma.hbm_to_vmem [thread:$0]  %s1054_s5, 2048, %s983_s8, [#allocation9], %s907_s1, %s907_s1, %s908_s25  }
  0x45   :  { %895 = dma.done.wait [#allocation3], 128  }
  0x46   :  { %896 = vsyncadd [#allocation3], 4294967168 }
  0x47   :  { %897 = dma.done.wait [#allocation6], 4352  }
  0x48   :  { %898 = vsyncadd [#allocation6], 4294962944 }
  0x49   :  { %899 = dma.done.wait [#allocation9], 2048  }
  0x4a   :  { %900 = vsyncadd [#allocation9], 4294965248  ;;  %v911_v0 = vmov 0   ;;  %v713_v1 = vld [vmem:[#allocation5 + $0x4] ss:$8 sps:$4 sm:$0xff]   ;;  %v716_v3 = vld [vmem:[#allocation2] sm:$0xff]   ;;  %v89_v47 = vlaneseq }
  0x4b   :  { %150 = vmatprep.mubr.bf16.mxu0 %v911_v0  ;;  %v715_v2 = vld [vmem:[#allocation5] ss:$8 sps:$4 sm:$0xff]   ;;  %118 = vmatprep.subr.bf16.mxu0 %v713_v1  ;;  %vm114_vm0 = vcmask 130048   ;;  %v717_v4 = vld [vmem:[#allocation7 + $0x4] ss:$8 sps:$4 sm:$0xff]  }
  0x4c   :  { %119 = vmatpush1.bf16.msra.mxu0 %v715_v2  ;;  %v719_v5 = vld [vmem:[#allocation7] ss:$8 sps:$4 sm:$0xff]   ;;  %v720_v6 = vld [vmem:[#allocation7 + $0x14] ss:$8 sps:$4 sm:$0xff]   ;;  %369 = vmatprep.subr.bf16.mxu1 %v717_v4  ;;  %v722_v7 = vld [vmem:[#allocation7 + $0x10] ss:$8 sps:$4 sm:$0xff]  }
  0x4d   :  { %370 = vmatpush1.bf16.msra.mxu1 %v719_v5  ;;  %v723_v8 = vld [vmem:[#allocation7 + $0x24] ss:$8 sps:$4 sm:$0xff]   ;;  %v725_v9 = vld [vmem:[#allocation7 + $0x20] ss:$8 sps:$4 sm:$0xff]   ;;  %v726_v10 = vld [vmem:[#allocation7 + $0x34] ss:$8 sps:$4 sm:$0xff]  }
  0x4e   :  { %371 = vmatprep.subr.bf16.mxu1 %v720_v6  ;;  %v728_v11 = vld [vmem:[#allocation7 + $0x30] ss:$8 sps:$4 sm:$0xff]   ;;  %v729_v12 = vld [vmem:[#allocation7 + $0x44] ss:$8 sps:$4 sm:$0xff]   ;;  %v731_v13 = vld [vmem:[#allocation7 + $0x40] ss:$8 sps:$4 sm:$0xff]  }
  0x4f   :  { %631 = vmatmul.mubr.msk.bf16.vlgmr.msra.gmra.mrb[0].mxu0 %vm114_vm0, %v716_v3  ;;  %v732_v14 = vld [vmem:[#allocation7 + $0x54] ss:$8 sps:$4 sm:$0xff]   ;;  %v734_v15 = vld [vmem:[#allocation7 + $0x50] ss:$8 sps:$4 sm:$0xff]   ;;  %v735_v16 = vld [vmem:[#allocation7 + $0x64] ss:$8 sps:$4 sm:$0xff]  }
  0x50   :  { %v737_v17 = vld [vmem:[#allocation7 + $0x60] ss:$8 sps:$4 sm:$0xff]   ;;  %v738_v18 = vld [vmem:[#allocation7 + $0x74] ss:$8 sps:$4 sm:$0xff]   ;;  %v740_v19 = vld [vmem:[#allocation7 + $0x70] ss:$8 sps:$4 sm:$0xff]  }
  0x51   :  { %372 = vmatpush1.bf16.msra.mxu1 %v722_v7  ;;  %v741_v20 = vld [vmem:[#allocation7 + $0x84] ss:$8 sps:$4 sm:$0xff]   ;;  %v743_v21 = vld [vmem:[#allocation7 + $0x80] ss:$8 sps:$4 sm:$0xff]   ;;  %v744_v22 = vld [vmem:[#allocation7 + $0x94] ss:$8 sps:$4 sm:$0xff]  }
  0x52   :  { %373 = vmatprep.subr.bf16.mxu1 %v723_v8  ;;  %v746_v23 = vld [vmem:[#allocation7 + $0x90] ss:$8 sps:$4 sm:$0xff]   ;;  %v747_v24 = vld [vmem:[#allocation7 + $0xa4] ss:$8 sps:$4 sm:$0xff]   ;;  %v749_v25 = vld [vmem:[#allocation7 + $0xa0] ss:$8 sps:$4 sm:$0xff]  }
  0x53   :  { %v750_v26 = vld [vmem:[#allocation7 + $0xb4] ss:$8 sps:$4 sm:$0xff]   ;;  %v752_v27 = vld [vmem:[#allocation7 + $0xb0] ss:$8 sps:$4 sm:$0xff]   ;;  %v753_v28 = vld [vmem:[#allocation7 + $0xc4] ss:$8 sps:$4 sm:$0xff]  }
  0x54   :  { %v755_v29 = vld [vmem:[#allocation7 + $0xc0] ss:$8 sps:$4 sm:$0xff]   ;;  %v756_v30 = vld [vmem:[#allocation7 + $0xd4] ss:$8 sps:$4 sm:$0xff]   ;;  %v758_v31 = vld [vmem:[#allocation7 + $0xd0] ss:$8 sps:$4 sm:$0xff]  }
  0x55   :  { %374 = vmatpush1.bf16.msra.mxu1 %v725_v9  ;;  %v759_v32 = vld [vmem:[#allocation7 + $0xe4] ss:$8 sps:$4 sm:$0xff]   ;;  %v761_v33 = vld [vmem:[#allocation7 + $0xe0] ss:$8 sps:$4 sm:$0xff]   ;;  %v762_v34 = vld [vmem:[#allocation7 + $0xf4] ss:$8 sps:$4 sm:$0xff]  }
  0x56   :  { %375 = vmatprep.subr.bf16.mxu1 %v726_v10  ;;  %v764_v35 = vld [vmem:[#allocation7 + $0xf0] ss:$8 sps:$4 sm:$0xff]   ;;  %v765_v36 = vld [vmem:[#allocation8 + $0x40] sm:$0xff]   ;;  %v767_v38 = vld [vmem:[#allocation8 + $0x48] sm:$0xff]   ;;  %v90_v48 = vshrl.u32 %v89_v47, 7 }
  0x57   :  { %v766_v37 = vld [vmem:[#allocation8] sm:$0xff]   ;;  %681 = vmatprep.subr.bf16.mxu0 %v765_v36  ;;  %v768_v39 = vld [vmem:[#allocation8 + $0x8] sm:$0xff]   ;;  %v769_v40 = vld [vmem:[#allocation8 + $0x50] sm:$0xff]  }
  0x58   :  { %682 = vmatpush3.bf16.msra.mxu0 %v766_v37  ;;  %v770_v41 = vld [vmem:[#allocation8 + $0x10] sm:$0xff]   ;;  %v771_v42 = vld [vmem:[#allocation8 + $0x58] sm:$0xff]   ;;  %v773_v44 = vld [vmem:[#allocation8 + $0x60] sm:$0xff]   ;;  %v91_v49 = vsub.s32 0, %v90_v48  ;;  %v95_v51 = vsub.s32 1, %v90_v48 }
  0x59   :  { %376 = vmatpush1.bf16.msra.mxu1 %v728_v11  ;;  %683 = vmatprep.subr.bf16.mxu0 %v767_v38  ;;  %v772_v43 = vld [vmem:[#allocation8 + $0x18] sm:$0xff]   ;;  %v774_v45 = vld [vmem:[#allocation8 + $0x20] sm:$0xff]   ;;  %v775_v46 = vld [vmem:[#allocation8 + $0x68] sm:$0xff]  }
  0x5a   :  { %377 = vmatprep.subr.bf16.mxu1 %v729_v12  ;;  %v87_v50 = vld [vmem:[%s1051_s2] sm:$0x3]  ;;  %v777_v4 = vld [vmem:[#allocation8 + $0x70] sm:$0xff]   ;;  %v779_v6 = vld [vmem:[#allocation8 + $0x78] sm:$0xff]  }
  0x5b   :  { %v92_v52 = vrot.slane %v87_v50, %v91_v49  ;;  %v96_v54 = vrot.slane %v87_v50, %v95_v51  ;;  %v776_v3 = vld [vmem:[#allocation8 + $0x28] sm:$0xff]   ;;  %v778_v5 = vld [vmem:[#allocation8 + $0x30] sm:$0xff]   ;;  %v780_v7 = vld [vmem:[#allocation8 + $0x38] sm:$0xff]  }
  0x5c   :  { %684 = vmatpush3.bf16.msra.mxu0 %v768_v39  ;;  %v197_v8 = vld [vmem:[%s1053_s4] sm:$0x3] }
  0x5d   :  { %378 = vmatpush1.bf16.msra.mxu1 %v731_v13  ;;  %685 = vmatprep.subr.bf16.mxu0 %v769_v40  ;;  %v202_v9 = vrot.slane %v197_v8, %v91_v49  ;;  %v206_v11 = vrot.slane %v197_v8, %v95_v51 }
  0x5e   :  { %379 = vmatprep.subr.bf16.mxu1 %v732_v14 }
  0x60   :  { %686 = vmatpush3.bf16.msra.mxu0 %v770_v41 }
  0x61   :  { %380 = vmatpush1.bf16.msra.mxu1 %v734_v15  ;;  %687 = vmatprep.subr.bf16.mxu0 %v771_v42 }
  0x62   :  { %381 = vmatprep.subr.bf16.mxu1 %v735_v16 }
  0x64   :  { %688 = vmatpush3.bf16.msra.mxu0 %v772_v43 }
  0x65   :  { %382 = vmatpush1.bf16.msra.mxu1 %v737_v17  ;;  %689 = vmatprep.subr.bf16.mxu0 %v773_v44 }
  0x66   :  { %383 = vmatprep.subr.bf16.mxu1 %v738_v18 }
  0x68   :  { %690 = vmatpush3.bf16.msra.mxu0 %v774_v45 }
  0x69   :  { %384 = vmatpush1.bf16.msra.mxu1 %v740_v19  ;;  %691 = vmatprep.subr.bf16.mxu0 %v775_v46 }
  0x6a   :  { %385 = vmatprep.subr.bf16.mxu1 %v741_v20 }
  0x6c   :  { %692 = vmatpush3.bf16.msra.mxu0 %v776_v3 }
  0x6d   :  { %386 = vmatpush1.bf16.msra.mxu1 %v743_v21  ;;  %693 = vmatprep.subr.bf16.mxu0 %v777_v4 }
  0x6e   :  { %387 = vmatprep.subr.bf16.mxu1 %v744_v22 }
  0x70   :  { %694 = vmatpush3.bf16.msra.mxu0 %v778_v5 }
  0x71   :  { %388 = vmatpush1.bf16.msra.mxu1 %v746_v23  ;;  %695 = vmatprep.subr.bf16.mxu0 %v779_v6 }
  0x72   :  { %389 = vmatprep.subr.bf16.mxu1 %v747_v24  ;;  %v664_v24 = vld [vmem:[%s1055_s6] ss:$0 sm:$0xff]  ;;  %s912_s6 = smov [#allocation10]  }
  0x73   :  { %s614_s8 = sshll.u32 %s912_s6, 4  ;;  %s615_s8 = int_to_ptr.vmem [resolvable:$true] %s614_s8 }
  0x74   :  { %696 = vmatpush3.bf16.msra.mxu0 %v780_v7  ;;  %s873_s9 = scalar_lea.vmem %s615_s8, 256  ;;  %p878_p5 = scmp.lt.s32.totalorder %s615_s8, %s615_s8 }
  0x75   :  { %390 = vmatpush1.bf16.msra.mxu1 %v749_v25  ;;  %p874_p4 = scmp.ne.s32.totalorder %s615_s8, %s873_s9  ;;  %p879_p6 = scmp.lt.s32.totalorder %s873_s9, %s873_s9 }
  0x76   :  { %391 = vmatprep.subr.bf16.mxu1 %v750_v26 }
  0x77   :  { %p880_p7 = por %p879_p6, %p878_p5 }
  0x79   :  { %392 = vmatpush1.bf16.msra.mxu1 %v752_v27  ;;  %p881_p8 = pnand %p880_p7, %p874_p4 }
  0x7a   :  { %393 = vmatprep.subr.bf16.mxu1 %v753_v28 }
  0x7d   :  { %394 = vmatpush1.bf16.msra.mxu1 %v755_v29 }
  0x7e   :  { %395 = vmatprep.subr.bf16.mxu1 %v756_v30 }
  0x81   :  { %396 = vmatpush1.bf16.msra.mxu1 %v758_v31 }
  0x82   :  { %397 = vmatprep.subr.bf16.mxu1 %v759_v32  ;;  %v601_v32 = vand.u32 127, %v89_v47 }
  0x84   :  { %vm602_vm1 = vcmp.ge.s32.totalorder %v601_v32, 4  ;;  %vm603_vm2 = vcmp.lt.s32.totalorder %v601_v32, 8 }
  0x85   :  { %398 = vmatpush1.bf16.msra.mxu1 %v761_v33  ;;  %vm604_vm3 = vmand %vm602_vm1, %vm603_vm2 }
  0x86   :  { %399 = vmatprep.subr.bf16.mxu1 %v762_v34 }
  0x89   :  { %400 = vmatpush1.bf16.msra.mxu1 %v764_v35 }
 0x122   :  { %v152_v53 = vpop.f32.mrb[0].mxu0 }
 0x123   :  { %v154_v55 = vpop.f32.mrb[1].mxu0  ;;  %v153_v57 = vadd.f32 %v152_v53, %v92_v52 }
 0x124   :  { %v156_v56 = vpop.f32.mrb[2].mxu0  ;;  %v155_v60 = vadd.f32 %v154_v55, %v96_v54 }
 0x125   :  { %v157_v58 = vadd.f32 %v156_v56, %v92_v52  ;;  %v158_v59 = vpop.f32.mrb[3].mxu0 }
 0x126   :  { %v159_v61 = vadd.f32 %v158_v59, %v96_v54 }
 0x127   :  { %v161_v62 = vpack.c.bf16 %v157_v58, %v153_v57 }
 0x128   :  { %v162_v63 = vpack.c.bf16 %v159_v61, %v155_v60 }
 0x129   :  { %v163_v2 = vmax.bf16 %v911_v0, %v161_v62 }
 0x12a   :  { %v164_v1 = vmax.bf16 %v911_v0, %v162_v63 }
 0x12c   :  { %401 = vmatprep.mubr.bf16.mxu1 %v164_v1 }
 0x12d   :  { %402 = vmatmul.mubr.bf16.vlgmr.msra.gmra.mrb[0].mxu1 %v163_v2 }
 0x200   :  { %v403_v10 = vpop.f32.mrb[0].mxu1 }
 0x201   :  { %v405_v12 = vpop.f32.mrb[1].mxu1  ;;  %v404_v14 = vadd.f32 %v403_v10, %v202_v9 }
 0x202   :  { %v407_v13 = vpop.f32.mrb[2].mxu1  ;;  %v406_v17 = vadd.f32 %v405_v12, %v206_v11 }
 0x203   :  { %v408_v15 = vadd.f32 %v407_v13, %v202_v9  ;;  %v409_v16 = vpop.f32.mrb[3].mxu1 }
 0x204   :  { %v410_v18 = vadd.f32 %v409_v16, %v206_v11 }
 0x205   :  { %v412_v19 = vpack.c.bf16 %v408_v15, %v404_v14 }
 0x206   :  { %v413_v20 = vpack.c.bf16 %v410_v18, %v406_v17 }
 0x207   :  { %v414_v22 = vmax.bf16 %v911_v0, %v412_v19 }
 0x208   :  { %v415_v21 = vmax.bf16 %v911_v0, %v413_v20 }
 0x20a   :  { %583 = vmatprep.mubr.bf16.mxu0 %v415_v21 }
 0x20b   :  { %584 = vmatmul.mubr.bf16.vlgmr.msra.gmra.mrb[4].mxu0 %v414_v22 }
 0x2de   :  { %v697_v23 = vpop.f32.mrb[4].mxu0 }
 0x2df   :  { %v698_v25 = vpop.f32.mrb[5].mxu0 }
 0x2e0   :  { %v699_v26 = vadd.f32 %v698_v25, %v697_v23  ;;  %v700_v27 = vpop.f32.mrb[6].mxu0 }
 0x2e1   :  { %v701_v28 = vpop.f32.mrb[7].mxu0 }
 0x2e2   :  { %v586_v29 = vadd.f32 %v699_v26, %v664_v24  ;;  %v702_v30 = vadd.f32 %v701_v28, %v700_v27 }
 0x2e4   :  { %781 = vtanh.f32 %v586_v29  ;;  %v589_v31 = vadd.f32 %v702_v30, %v664_v24 }
 0x2e6   :  { %783 = vtanh.f32 %v589_v31 }
 0x2ee   :  { %v782_v33 = vpop.eup %781 }
 0x2ef   :  { %v594_v34 = vadd.f32 1.0, %v782_v33 }
 0x2f0   :  { %v784_v0 = vpop.eup %783 }
 0x2f1   :  { %v596_v35 = vmul.f32 3.5, %v594_v34  ;;  %v595_v36 = vadd.f32 1.0, %v784_v0 }
 0x2f3   :  { %v598_v37 = vadd.f32 -5.0, %v596_v35  ;;  %v597_v38 = vmul.f32 3.5, %v595_v36 }
 0x2f5   :  { %v599_v39 = vadd.f32 -5.0, %v597_v38  ;;  %v605_v40 = vsel %vm604_vm3, %v598_v37, %v586_v29 }
 0x2f6   :  { %607 = vst [vmem:[#allocation10] sm:$0xff] %v605_v40 }
 0x2f7   :  { %v606_v41 = vsel %vm604_vm3, %v599_v39, %v589_v31 }
 0x2f8   :  { %608 = vst [vmem:[#allocation10 + $0x8] sm:$0xff] %v606_v41 }
 0x2f9   :  { %884 = shalt.err (!%p881_p8)
}
 0x2fa   :  { %s885_s14 = scalar_lea.hbm %s1056_s7, 256 }
 0x2fb   :  { %p886_p9 = scmp.ne.s32.totalorder %s1056_s7, %s885_s14  ;;  %p889_p10 = scmp.lt.u32.totalorder %s885_s14, %s1056_s7 }
 0x2fd   :  { %p891_p11 = pnand %p889_p10, %p886_p9 }
 0x2ff   :  { %894 = shalt.err (!%p891_p11)
}
 0x300   :  { %620 = dma.vmem_to_hbm [thread:$0]  %s615_s8, 256, %s1056_s7, [#allocation4], %s904_s11, %s904_s11, %s905_s12  }
 0x301   :  { %901 = dma.done.wait [#allocation4], 256  }
 0x302   :  { %902 = vsyncadd [#allocation4], 4294967040 }
 0x303   :  { %624 = vsyncpa [#allocation3], 1 }
 0x304   :  { %625 = vsyncpa [#allocation6], 1 }
 0x305   :  { %626 = vsyncpa [#allocation9], 1 }
 0x306   :  { %627 = vsyncpa [#allocation4], 1 }

</bundles_post_ra>
